<compile_context>
chip_gen: v7x
topology: tpu7x:2x2x1
jax: 0.10.0
libtpu: 0.0.40
codegen_flags: <defaults>
</compile_context>

<pallas_src>
import functools

import jax
import jax.numpy as jnp
from jax.experimental import pallas as pl
from jax.experimental.pallas import tpu as pltpu

LANE = 128


def _round_up(x, m):
    return ((x + m - 1) // m) * m


# ---------------------------------------------------------------------------
# Kernels
# ---------------------------------------------------------------------------

def dynamics_mlp_kernel(x_ref, w1_ref, b1_ref, w2_ref, b2_ref, w3_ref, b3_ref,
                        o_ref):
    """relu(relu(x@W1+b1)@W2+b2)@W3+b3 for one (tb, S+A) batch tile.

    x is bf16 (pre-cast & pre-concatenated in the wrapper).  All kernel-visible
    feature dims (hidden, output) are padded to 128 lanes -> unmasked stores.
    """
    h1 = jnp.dot(x_ref[...], w1_ref[...], preferred_element_type=jnp.float32)
    h1 = jnp.maximum(h1 + b1_ref[...], 0.0)

    h2 = jnp.dot(h1.astype(jnp.bfloat16), w2_ref[...],
                 preferred_element_type=jnp.float32)
    h2 = jnp.maximum(h2 + b2_ref[...], 0.0)

    out = jnp.dot(h2.astype(jnp.bfloat16), w3_ref[...],
                  preferred_element_type=jnp.float32)
    o_ref[...] = (out + b3_ref[...]).astype(o_ref.dtype)


def dynamics_rollout_kernel(s0_ref, a_ref, w1s_ref, w1a_ref, b1_ref,
                            w2_ref, b2_ref, w3_ref, b3_ref, o_ref, s_scr):
    """One dynamics step at grid point (batch_tile b, time t).

    The current state lives in a VMEM scratch carried across the inner
    ("arbitrary") time axis; weights use constant index_maps so they stay
    VMEM-resident for the whole call.  Layer 1 uses the split-W1 form
    (s@W1s + a@W1a), so no in-kernel lane concatenate is needed.
    """
    t = pl.program_id(1)

    @pl.when(t == 0)
    def _():
        s_scr[...] = s0_ref[...]

    s = s_scr[...]                          # [tb, S]  bf16
    a = a_ref[0]                            # [tb, A]  bf16

    h1 = (jnp.dot(s, w1s_ref[...], preferred_element_type=jnp.float32) +
          jnp.dot(a, w1a_ref[...], preferred_element_type=jnp.float32))
    h1 = jnp.maximum(h1 + b1_ref[...], 0.0)

    h2 = jnp.dot(h1.astype(jnp.bfloat16), w2_ref[...],
                 preferred_element_type=jnp.float32)
    h2 = jnp.maximum(h2 + b2_ref[...], 0.0)

    out = jnp.dot(h2.astype(jnp.bfloat16), w3_ref[...],
                  preferred_element_type=jnp.float32)
    out = out + b3_ref[...]                 # [tb, Sp] f32 (padded cols exactly 0)

    o_ref[0] = out.astype(o_ref.dtype)
    # Carry next state (valid columns only) for step t+1.
    s_scr[...] = out[:, :s_scr.shape[1]].astype(s_scr.dtype)


# ---------------------------------------------------------------------------
# Parameters
# ---------------------------------------------------------------------------

def init_params(key, state_dim, action_dim, hidden_dim):
    """PyTorch-convention params: W [out,in], b [out], uniform(-1/sqrt(fan_in))."""
    keys = jax.random.split(key, 6)

    def linear(kw, kb, fan_in, fan_out):
        bound = 1.0 / jnp.sqrt(jnp.float32(fan_in))
        w = jax.random.uniform(kw, (fan_out, fan_in), jnp.float32,
                               minval=-bound, maxval=bound)
        b = jax.random.uniform(kb, (fan_out,), jnp.float32,
                               minval=-bound, maxval=bound)
        return w, b

    w1, b1 = linear(keys[0], keys[1], state_dim + action_dim, hidden_dim)
    w2, b2 = linear(keys[2], keys[3], hidden_dim, hidden_dim)
    w3, b3 = linear(keys[4], keys[5], hidden_dim, state_dim)
    return {"w1": w1, "b1": b1, "w2": w2, "b2": b2, "w3": w3, "b3": b3}


def prepare_params(params, state_dim):
    """One-time layout conversion: transpose to [in,out], zero-pad hidden and
    output feature dims to multiples of 128 lanes, cast weights to bf16,
    biases to [1, out] f32 rows for sublane broadcast."""
    hidden_dim = params["w2"].shape[0]
    h_pad = _round_up(hidden_dim, LANE)
    s_pad = _round_up(state_dim, LANE)

    def pad2(x, rows, cols):
        return jnp.pad(x, ((0, rows - x.shape[0]), (0, cols - x.shape[1])))

    w1 = pad2(params["w1"].T, params["w1"].shape[1], h_pad).astype(jnp.bfloat16)
    w2 = pad2(params["w2"].T, h_pad, h_pad).astype(jnp.bfloat16)
    w3 = pad2(params["w3"].T, h_pad, s_pad).astype(jnp.bfloat16)

    def pad_bias(b, n):
        return jnp.pad(b, (0, n - b.shape[0])).reshape(1, -1).astype(jnp.float32)

    return {
        "w1": w1,                      # [S+A, Hp]  fused (forward kernel)
        "w1s": w1[:state_dim],         # [S,   Hp]  split (rollout kernel)
        "w1a": w1[state_dim:],         # [A,   Hp]
        "b1": pad_bias(params["b1"], h_pad),
        "w2": w2,                      # [Hp, Hp]
        "b2": pad_bias(params["b2"], h_pad),
        "w3": w3,                      # [Hp, Sp]
        "b3": pad_bias(params["b3"], s_pad),
    }


# ---------------------------------------------------------------------------
# Tiling / VMEM helpers
# ---------------------------------------------------------------------------

def _batch_tile(batch, tile_b):
    """Batch tile: multiple of 8 (sublane), big enough to amortize the ~0.35us
    per-grid-step overhead, capped at ceil(batch/2) so the 'parallel' batch
    axis yields >= 2 tiles and both v7x TensorCores get work."""
    if batch < 16:
        return batch                     # single full-batch tile
    half = _round_up(pl.cdiv(batch, 2), 8)
    tb = min(tile_b, batch, half)
    return max(8, (tb // 8) * 8)


def _vmem_limit(bytes_needed):
    """Actual footprint x2 headroom, floored at 8 MiB, capped at 32 MiB
    (v7x has only 64 MiB physical per TC; never request all of it)."""
    return int(min(max(2 * bytes_needed, 8 << 20), 32 << 20))


# ---------------------------------------------------------------------------
# Wrappers
# ---------------------------------------------------------------------------

@functools.partial(jax.jit, static_argnames=("tile_b",))
def dynamics_model_forward(state, action, kp, *, tile_b=1024):
    """state [B,S] f32, action [B,A] f32, kp = prepare_params(...) -> [B,S] f32."""
    batch, state_dim = state.shape
    in_dim = state_dim + action.shape[1]
    h_pad = kp["w2"].shape[0]
    s_pad = kp["w3"].shape[1]

    # Fold torch.cat into one tiny XLA concat, in bf16 (halves activation DMA
    # bytes; one MXU push for layer 1 instead of two small-K dots).
    x = jnp.concatenate([state, action], axis=-1).astype(jnp.bfloat16)

    tb = _batch_tile(batch, tile_b)
    grid = (pl.cdiv(batch, tb),)

    flops = 2 * batch * (in_dim * h_pad + h_pad * h_pad + h_pad * s_pad)
    weight_bytes = 2 * (in_dim * h_pad + h_pad * h_pad + h_pad * s_pad)
    bias_bytes = 4 * (2 * h_pad + s_pad)
    bytes_accessed = weight_bytes + bias_bytes + batch * in_dim * 2 + batch * s_pad * 4

    # Conservative VMEM need: everything double-buffered.
    vmem_need = 2 * (tb * in_dim * 2 + tb * s_pad * 4 + weight_bytes + bias_bytes)

    resident = lambda shape: pl.BlockSpec(shape, lambda i: (0,) * len(shape))
    # TODO(synk): if hidden_dim is scaled up (>= ~2K), single-buffer the resident
    # weight blocks (pipeline_mode=pl.Buffered(1)) and add a K-reduction grid
    # axis for W2 to stay inside v7x's 64 MiB VMEM.

    out_full = pl.pallas_call(
        dynamics_mlp_kernel,
        out_shape=jax.ShapeDtypeStruct((batch, s_pad), jnp.float32),
        grid=grid,
        in_specs=[
            pl.BlockSpec((tb, in_dim), lambda i: (i, 0)),   # x tile (batch-tiled)
            resident((in_dim, h_pad)),                      # W1 (VMEM-resident)
            resident((1, h_pad)),                           # b1
            resident((h_pad, h_pad)),                       # W2
            resident((1, h_pad)),                           # b2
            resident((h_pad, s_pad)),                       # W3
            resident((1, s_pad)),                           # b3
        ],
        out_specs=pl.BlockSpec((tb, s_pad), lambda i: (i, 0)),
        compiler_params=pltpu.CompilerParams(
            dimension_semantics=("parallel",),              # megacore on v7x
            vmem_limit_bytes=_vmem_limit(vmem_need)),
        cost_estimate=pl.CostEstimate(
            flops=flops, transcendentals=0, bytes_accessed=bytes_accessed),
    )(x, kp["w1"], kp["b1"], kp["w2"], kp["b2"], kp["w3"], kp["b3"])

    # Padded output columns are exactly zero; drop them.
    return out_full[:, :state_dim]


@functools.partial(jax.jit, static_argnames=("tile_b",))
def dynamics_model_rollout(state0, actions, kp, *, tile_b=1024):
    """Fused T-step MBRL rollout in one pallas_call.

    state0 [B,S] f32, actions [T,B,A] f32 -> predicted states [T,B,S] f32.
    Weights stay VMEM-resident for all T steps; state is carried in VMEM.
    """
    batch, state_dim = state0.shape
    T, _, action_dim = actions.shape
    h_pad = kp["w2"].shape[0]
    s_pad = kp["w3"].shape[1]

    s0 = state0.astype(jnp.bfloat16)
    acts = actions.astype(jnp.bfloat16)

    tb = _batch_tile(batch, tile_b)
    grid = (pl.cdiv(batch, tb), T)

    weight_bytes = (2 * ((state_dim + action_dim) * h_pad + h_pad * h_pad
                         + h_pad * s_pad) + 4 * (2 * h_pad + s_pad))
    vmem_need = (2 * (tb * (state_dim + action_dim) * 2 + tb * s_pad * 4
                      + weight_bytes) + tb * state_dim * 2)

    resident = lambda shape: pl.BlockSpec(shape, lambda b, t: (0,) * len(shape))

    out_full = pl.pallas_call(
        dynamics_rollout_kernel,
        out_shape=jax.ShapeDtypeStruct((T, batch, s_pad), jnp.float32),
        grid=grid,
        in_specs=[
            pl.BlockSpec((tb, state_dim), lambda b, t: (b, 0)),         # s0
            pl.BlockSpec((1, tb, action_dim), lambda b, t: (t, b, 0)),  # a_t
            resident((state_dim, h_pad)),                               # W1s
            resident((action_dim, h_pad)),                              # W1a
            resident((1, h_pad)),                                       # b1
            resident((h_pad, h_pad)),                                   # W2
            resident((1, h_pad)),                                       # b2
            resident((h_pad, s_pad)),                                   # W3
            resident((1, s_pad)),                                       # b3
        ],
        out_specs=pl.BlockSpec((1, tb, s_pad), lambda b, t: (t, b, 0)),
        scratch_shapes=[pltpu.VMEM((tb, state_dim), jnp.bfloat16)],     # carried state
        compiler_params=pltpu.CompilerParams(
            dimension_semantics=("parallel", "arbitrary"),
            vmem_limit_bytes=_vmem_limit(vmem_need)),
    )(s0, acts, kp["w1s"], kp["w1a"], kp["b1"],
      kp["w2"], kp["b2"], kp["w3"], kp["b3"])

    return out_full[:, :, :state_dim]


# ---------------------------------------------------------------------------
# Demo / correctness check
# ---------------------------------------------------------------------------

if __name__ == "__main__":
    key = jax.random.PRNGKey(0)
    k_params, k_state, k_action, k_roll = jax.random.split(key, 4)

    batch = 32
    state_dim = 16
    action_dim = 8
    hidden_dim = 32
    T = 4

    params = init_params(k_params, state_dim, action_dim, hidden_dim)
    kp = prepare_params(params, state_dim)

    state = jax.random.normal(k_state, (batch, state_dim), jnp.float32)
    action = jax.random.normal(k_action, (batch, action_dim), jnp.float32)
    actions_seq = jax.random.normal(k_roll, (T, batch, action_dim), jnp.float32)

    # --- single-step forward -------------------------------------------------
    out = jax.block_until_ready(dynamics_model_forward(state, action, kp))
    assert out.shape == (batch, state_dim)

    def bdot(x, w):
        return jnp.dot(x.astype(jnp.bfloat16), w,
                       preferred_element_type=jnp.float32)

    # Reference 1: exact bf16-MXU mirror in plain JAX (tight tolerance).
    xb = jnp.concatenate([state, action], axis=-1)
    h1 = jnp.maximum(bdot(xb, kp["w1"]) + kp["b1"], 0.0)
    h2 = jnp.maximum(bdot(h1, kp["w2"]) + kp["b2"], 0.0)
    ref_bf16 = (bdot(h2, kp["w3"]) + kp["b3"])[:, :state_dim]
    assert jnp.allclose(out, ref_bf16, atol=1e-3, rtol=1e-3)

    # Reference 2: full-f32 PyTorch-equivalent math (loose tolerance, checks
    # semantics of the original module: concat -> 3x Linear with ReLUs).
    x = jnp.concatenate([state, action], axis=-1)
    h1f = jnp.maximum(x @ params["w1"].T + params["b1"], 0.0)
    h2f = jnp.maximum(h1f @ params["w2"].T + params["b2"], 0.0)
    ref_f32 = h2f @ params["w3"].T + params["b3"]
    assert jnp.allclose(out, ref_f32, atol=3e-2, rtol=3e-2)

    # --- fused T-step rollout -------------------------------------------------
    roll = jax.block_until_ready(dynamics_model_rollout(state, actions_seq, kp))
    assert roll.shape == (T, batch, state_dim)

    s = state
    ref_steps = []
    for t in range(T):
        h1r = jnp.maximum(bdot(s, kp["w1s"]) + bdot(actions_seq[t], kp["w1a"])
                          + kp["b1"], 0.0)
        h2r = jnp.maximum(bdot(h1r, kp["w2"]) + kp["b2"], 0.0)
        o = (bdot(h2r, kp["w3"]) + kp["b3"])[:, :state_dim]
        ref_steps.append(o)
        s = o
    ref_roll = jnp.stack(ref_steps)
    assert jnp.allclose(roll, ref_roll, atol=2e-3, rtol=2e-3)

    print("KERNEL_OK")
</pallas_src>

<mosaic_0001>
module attributes {stable_mosaic.version = 11 : i64} {
  func.func @dynamics_mlp_kernel(%arg0: i32, %arg1: memref<16x24xbf16, #tpu.memory_space<vmem>>, %arg2: memref<24x128xbf16, #tpu.memory_space<vmem>>, %arg3: memref<1x128xf32, #tpu.memory_space<vmem>>, %arg4: memref<128x128xbf16, #tpu.memory_space<vmem>>, %arg5: memref<1x128xf32, #tpu.memory_space<vmem>>, %arg6: memref<128x128xbf16, #tpu.memory_space<vmem>>, %arg7: memref<1x128xf32, #tpu.memory_space<vmem>>, %arg8: memref<16x128xf32, #tpu.memory_space<vmem>>) attributes {dimension_semantics = [#tpu.dimension_semantics<parallel>], iteration_bounds = array<i64: 2>, scalar_prefetch = 0 : i64, scratch_operands = 0 : i64, tpu.core_type = #tpu.core_type<tc>, window_params = [{transform_indices = @transform_0, window_bounds = array<i64: 16, 24>}, {pipeline_mode = #tpu.pipeline_mode<synchronous>, transform_indices = @transform_1, window_bounds = array<i64: 24, 128>}, {pipeline_mode = #tpu.pipeline_mode<synchronous>, transform_indices = @transform_2, window_bounds = array<i64: 1, 128>}, {pipeline_mode = #tpu.pipeline_mode<synchronous>, transform_indices = @transform_3, window_bounds = array<i64: 128, 128>}, {pipeline_mode = #tpu.pipeline_mode<synchronous>, transform_indices = @transform_4, window_bounds = array<i64: 1, 128>}, {pipeline_mode = #tpu.pipeline_mode<synchronous>, transform_indices = @transform_5, window_bounds = array<i64: 128, 128>}, {pipeline_mode = #tpu.pipeline_mode<synchronous>, transform_indices = @transform_6, window_bounds = array<i64: 1, 128>}, {transform_indices = @transform_7, window_bounds = array<i64: 16, 128>}]} {
    %c0 = arith.constant 0 : index
    %c0_0 = arith.constant 0 : index
    %0 = vector.load %arg1[%c0, %c0_0] : memref<16x24xbf16, #tpu.memory_space<vmem>>, vector<16x24xbf16>
    %c0_1 = arith.constant 0 : index
    %c0_2 = arith.constant 0 : index
    %1 = vector.load %arg2[%c0_1, %c0_2] : memref<24x128xbf16, #tpu.memory_space<vmem>>, vector<24x128xbf16>
    %cst = arith.constant dense<0.000000e+00> : vector<16x128xf32>
    %2 = tpu.matmul %0, %1, %cst {dimension_numbers = #tpu.dot_dimension_numbers<[1], [0], [0], [1], [0, 0, 1, 1], [], []>} : vector<16x24xbf16>, vector<24x128xbf16>, vector<16x128xf32> -> vector<16x128xf32>
    %c0_3 = arith.constant 0 : index
    %c0_4 = arith.constant 0 : index
    %3 = vector.load %arg3[%c0_3, %c0_4] : memref<1x128xf32, #tpu.memory_space<vmem>>, vector<1x128xf32>
    %4 = vector.broadcast %3 : vector<1x128xf32> to vector<16x128xf32>
    %5 = arith.addf %2, %4 : vector<16x128xf32>
    %cst_5 = arith.constant 0.000000e+00 : f32
    %6 = vector.broadcast %cst_5 : f32 to vector<16x128xf32>
    %7 = arith.maximumf %5, %6 : vector<16x128xf32>
    %8 = arith.truncf %7 : vector<16x128xf32> to vector<16x128xbf16>
    %c0_6 = arith.constant 0 : index
    %c0_7 = arith.constant 0 : index
    %9 = vector.load %arg4[%c0_6, %c0_7] : memref<128x128xbf16, #tpu.memory_space<vmem>>, vector<128x128xbf16>
    %cst_8 = arith.constant dense<0.000000e+00> : vector<16x128xf32>
    %10 = tpu.matmul %8, %9, %cst_8 {dimension_numbers = #tpu.dot_dimension_numbers<[1], [0], [0], [1], [0, 0, 1, 1], [], []>} : vector<16x128xbf16>, vector<128x128xbf16>, vector<16x128xf32> -> vector<16x128xf32>
    %c0_9 = arith.constant 0 : index
    %c0_10 = arith.constant 0 : index
    %11 = vector.load %arg5[%c0_9, %c0_10] : memref<1x128xf32, #tpu.memory_space<vmem>>, vector<1x128xf32>
    %12 = vector.broadcast %11 : vector<1x128xf32> to vector<16x128xf32>
    %13 = arith.addf %10, %12 : vector<16x128xf32>
    %cst_11 = arith.constant 0.000000e+00 : f32
    %14 = vector.broadcast %cst_11 : f32 to vector<16x128xf32>
    %15 = arith.maximumf %13, %14 : vector<16x128xf32>
    %16 = arith.truncf %15 : vector<16x128xf32> to vector<16x128xbf16>
    %c0_12 = arith.constant 0 : index
    %c0_13 = arith.constant 0 : index
    %17 = vector.load %arg6[%c0_12, %c0_13] : memref<128x128xbf16, #tpu.memory_space<vmem>>, vector<128x128xbf16>
    %cst_14 = arith.constant dense<0.000000e+00> : vector<16x128xf32>
    %18 = tpu.matmul %16, %17, %cst_14 {dimension_numbers = #tpu.dot_dimension_numbers<[1], [0], [0], [1], [0, 0, 1, 1], [], []>} : vector<16x128xbf16>, vector<128x128xbf16>, vector<16x128xf32> -> vector<16x128xf32>
    %c0_15 = arith.constant 0 : index
    %c0_16 = arith.constant 0 : index
    %19 = vector.load %arg7[%c0_15, %c0_16] : memref<1x128xf32, #tpu.memory_space<vmem>>, vector<1x128xf32>
    %20 = vector.broadcast %19 : vector<1x128xf32> to vector<16x128xf32>
    %21 = arith.addf %18, %20 : vector<16x128xf32>
    %c0_17 = arith.constant 0 : index
    %c0_18 = arith.constant 0 : index
    %22 = vector.load %arg8[%c0_17, %c0_18] : memref<16x128xf32, #tpu.memory_space<vmem>>, vector<16x128xf32>
    tpu.vector_store %arg8[%c0_17, %c0_18], %21 {strides = array<i32>} : memref<16x128xf32, #tpu.memory_space<vmem>>, vector<16x128xf32>,
    return
  }
  func.func @transform_0(%arg0: i32) -> (i32, i32) {
    %c0_i32 = arith.constant 0 : i32
    %c0_i32_0 = arith.constant 0 : i32
    return %arg0, %c0_i32 : i32, i32
  }
  func.func @transform_1(%arg0: i32) -> (i32, i32) {
    %c0_i32 = arith.constant 0 : i32
    %c0_i32_0 = arith.constant 0 : i32
    %c0_i32_1 = arith.constant 0 : i32
    return %c0_i32, %c0_i32_0 : i32, i32
  }
  func.func @transform_2(%arg0: i32) -> (i32, i32) {
    %c0_i32 = arith.constant 0 : i32
    %c0_i32_0 = arith.constant 0 : i32
    %c0_i32_1 = arith.constant 0 : i32
    return %c0_i32, %c0_i32_0 : i32, i32
  }
  func.func @transform_3(%arg0: i32) -> (i32, i32) {
    %c0_i32 = arith.constant 0 : i32
    %c0_i32_0 = arith.constant 0 : i32
    %c0_i32_1 = arith.constant 0 : i32
    return %c0_i32, %c0_i32_0 : i32, i32
  }
  func.func @transform_4(%arg0: i32) -> (i32, i32) {
    %c0_i32 = arith.constant 0 : i32
    %c0_i32_0 = arith.constant 0 : i32
    %c0_i32_1 = arith.constant 0 : i32
    return %c0_i32, %c0_i32_0 : i32, i32
  }
  func.func @transform_5(%arg0: i32) -> (i32, i32) {
    %c0_i32 = arith.constant 0 : i32
    %c0_i32_0 = arith.constant 0 : i32
    %c0_i32_1 = arith.constant 0 : i32
    return %c0_i32, %c0_i32_0 : i32, i32
  }
  func.func @transform_6(%arg0: i32) -> (i32, i32) {
    %c0_i32 = arith.constant 0 : i32
    %c0_i32_0 = arith.constant 0 : i32
    %c0_i32_1 = arith.constant 0 : i32
    return %c0_i32, %c0_i32_0 : i32, i32
  }
  func.func @transform_7(%arg0: i32) -> (i32, i32) {
    %c0_i32 = arith.constant 0 : i32
    %c0_i32_0 = arith.constant 0 : i32
    return %arg0, %c0_i32 : i32, i32
  }
}

</mosaic_0001>

<bundles_post_ra>
// kernel: dynamics_model_forward.1
= control target key start
LH: loop header
LB: loop body
LE: loop exit
PB: predicated region body
PF: predicated region fallthrough
CT: control target
= control target key end

     0   :  { %s828_s24 = smov 0   ;;  %s936_s0 = inlined_call_operand.vmem [shape: bf16[32,24], index: 0, kind: input, shape index: {}]   ;;  %s937_s1 = inlined_call_operand.vmem [shape: bf16[24,128], index: 1, kind: input, shape index: {}]   ;;  %s938_s2 = inlined_call_operand.vmem [shape: f32[1,128], index: 2, kind: input, shape index: {}]   ;;  %s939_s3 = inlined_call_operand.vmem [shape: bf16[128,128], index: 3, kind: input, shape index: {}]   ;;  %s940_s4 = inlined_call_operand.vmem [shape: f32[1,128], index: 4, kind: input, shape index: {}]   ;;  %s941_s5 = inlined_call_operand.vmem [shape: bf16[128,128], index: 5, kind: input, shape index: {}]   ;;  %s942_s6 = inlined_call_operand.vmem [shape: f32[1,128], index: 6, kind: input, shape index: {}]   ;;  %s943_s7 = inlined_call_operand.vmem [shape: f32[32,128], index: 7, kind: output, shape index: {}]  }
   0x1 LB: > { %s646_s25 = sadd.s32 4294967295, %s784_s24   ;;  %p650_p0 = scmp.ge.s32.totalorder %s784_s24, 1  ;;  %s784_s24 = sphi %s828_s24, %s17_s24  }
   0x2   : > { %p238_p1 = scmp.lt.s32.totalorder %s784_s24, 3 }
   0x4   : > { %p239_p2 = pnand %p650_p0, %p238_p1 }
   0x5   : > { %v759_v0 = vld [vmem:[%s937_s1] sm:$0xff] (!%p239_p2)   ;;  %v786_v1 = vmov (!%p239_p2), 0.0   ;;  %v760_v2 = vld [vmem:[%s937_s1 + $0x8] ss:$0 sps:$4 sm:$0xff] (!%p239_p2)   ;;  %vm313_vm0 = vcmask (!%p239_p2), 1043456   ;;  %vm787_vm1 = vmmov (!%p239_p2), 0  }
   0x6   : > { %242 = sbr.rel (%p239_p2) target bundleno = 674 (0x2a2), region = 48  ;;  %701 = vmatprep.subr.bf16.mxu0 (!%p239_p2), %v786_v1  ;;  %709 = vmatprep.subr.bf16.mxu1 (!%p239_p2), %v786_v1  ;;  %s651_s30 = sshll.u32 (!%p239_p2), %s646_s25, 1  ;;  %v315_v3 = vsel (!%p239_p2), %vm313_vm0, %v760_v2, 0  ;;  %v762_v4 = vld [vmem:[%s939_s3] sm:$0xff] (!%p239_p2)   ;;  %v763_v5 = vld [vmem:[%s939_s3 + $0x8] sm:$0xff] (!%p239_p2)   ;;  %vm309_vm2 = vcmask (!%p239_p2), 195584  }
   0x7   : > { %702 = vmatpush3.bf16.msra.mxu0 (!%p239_p2), %v759_v0  ;;  %705 = vmatprep.mubr.msk.bf16.mxu0 (!%p239_p2), %vm787_vm1, %v786_v1  ;;  %p271_p3 = scmp.lt.s32.totalorder (!%p239_p2), %s651_s30, 3  ;;  %v764_v6 = vld [vmem:[%s939_s3 + $0x10] sm:$0xff] (!%p239_p2)   ;;  %v765_v8 = vld [vmem:[%s939_s3 + $0x18] sm:$0xff] (!%p239_p2)   ;;  %v766_v9 = vld [vmem:[%s939_s3 + $0x20] sm:$0xff] (!%p239_p2)  }
   0x8   : > { %703 = vmatprep.subr.bf16.mxu0 (!%p239_p2), %v786_v1  ;;  %725 = vmatprep.mubr.msk.bf16.mxu1 (!%p239_p2), %vm787_vm1, %v786_v1  ;;  %v767_v10 = vld [vmem:[%s939_s3 + $0x28] sm:$0xff] (!%p239_p2)   ;;  %v768_v11 = vld [vmem:[%s939_s3 + $0x30] sm:$0xff] (!%p239_p2)   ;;  %v769_v12 = vld [vmem:[%s939_s3 + $0x38] sm:$0xff] (!%p239_p2)  }
   0x9   : > { %710 = vmatpush3.bf16.msra.mxu1 (!%p239_p2), %v762_v4  ;;  %v770_v13 = vld [vmem:[%s941_s5] sm:$0xff] (!%p239_p2)   ;;  %v771_v14 = vld [vmem:[%s941_s5 + $0x8] sm:$0xff] (!%p239_p2)   ;;  %v772_v15 = vld [vmem:[%s941_s5 + $0x10] sm:$0xff] (!%p239_p2)  }
   0xa   : > { %711 = vmatprep.subr.bf16.mxu1 (!%p239_p2), %v786_v1  ;;  %v773_v16 = vld [vmem:[%s941_s5 + $0x18] sm:$0xff] (!%p239_p2)   ;;  %v774_v17 = vld [vmem:[%s941_s5 + $0x20] sm:$0xff] (!%p239_p2)   ;;  %v775_v18 = vld [vmem:[%s941_s5 + $0x28] sm:$0xff] (!%p239_p2)  }
   0xb   : > { %704 = vmatpush3.bf16.msra.mxu0 (!%p239_p2), %v315_v3  ;;  %v655_v19 = vld [vmem:[%s938_s2] ss:$0 sm:$0xff] (!%p239_p2)  ;;  %v776_v29 = vld [vmem:[%s941_s5 + $0x30] sm:$0xff] (!%p239_p2)   ;;  %v777_v30 = vld [vmem:[%s941_s5 + $0x38] sm:$0xff] (!%p239_p2)  }
   0xc   : > { %729 = vmatprep.subr.bf16.mxu0 (!%p239_p2), %v786_v1  ;;  %v660_v31 = vld [vmem:[%s940_s4] ss:$0 sm:$0xff] (!%p239_p2) }
   0xd   : > { %s945_s30 = smov (!%p271_p3, %s651_s30), 3  ;;  %712 = vmatpush3.bf16.msra.mxu1 %v763_v5  ;;  %v669_v41 = vld [vmem:[%s942_s6] ss:$0 sm:$0xff] }
   0xe   : > { %s652_s12 = sshll.u32 %s945_s30, 2  ;;  %713 = vmatprep.subr.bf16.mxu1 %v786_v1  ;;  %s654_s28 = sshll.u32 %s945_s30, 3 }
   0xf   : > { %s274_s15 = scalar_lea.vmem %s936_s0, %s652_s12  ;;  %s280_s11 = scalar_lea.vmem %s943_s7, %s654_s28 }
  0x10   : > { %v761_v7 = vld [vmem:[%s274_s15] sm:$0xff]  }
  0x11   : > { %706 = vmatmul.mubr.msk.bf16.vlgmr.msra.gmra.mrb[0].mxu0 %vm309_vm2, %v761_v7  ;;  %714 = vmatpush3.bf16.msra.mxu1 %v764_v6 }
  0x12   : > { %745 = vmatprep.mubr.msk.bf16.mxu0 %vm787_vm1, %v786_v1  ;;  %715 = vmatprep.subr.bf16.mxu1 %v786_v1 }
  0x13   : > { %730 = vmatpush3.bf16.msra.mxu0 %v770_v13 }
  0x14   : > { %731 = vmatprep.subr.bf16.mxu0 %v786_v1 }
  0x15   : > { %716 = vmatpush3.bf16.msra.mxu1 %v765_v8 }
  0x16   : > { %717 = vmatprep.subr.bf16.mxu1 %v786_v1 }
  0x17   : > { %732 = vmatpush3.bf16.msra.mxu0 %v771_v14 }
  0x18   : > { %733 = vmatprep.subr.bf16.mxu0 %v786_v1 }
  0x19   : > { %718 = vmatpush3.bf16.msra.mxu1 %v766_v9 }
  0x1a   : > { %719 = vmatprep.subr.bf16.mxu1 %v786_v1 }
  0x1b   : > { %734 = vmatpush3.bf16.msra.mxu0 %v772_v15 }
  0x1c   : > { %735 = vmatprep.subr.bf16.mxu0 %v786_v1 }
  0x1d   : > { %720 = vmatpush3.bf16.msra.mxu1 %v767_v10 }
  0x1e   : > { %721 = vmatprep.subr.bf16.mxu1 %v786_v1 }
  0x1f   : > { %736 = vmatpush3.bf16.msra.mxu0 %v773_v16 }
  0x20   : > { %737 = vmatprep.subr.bf16.mxu0 %v786_v1 }
  0x21   : > { %722 = vmatpush3.bf16.msra.mxu1 %v768_v11 }
  0x22   : > { %723 = vmatprep.subr.bf16.mxu1 %v786_v1 }
  0x23   : > { %738 = vmatpush3.bf16.msra.mxu0 %v774_v17 }
  0x24   : > { %739 = vmatprep.subr.bf16.mxu0 %v786_v1 }
  0x25   : > { %724 = vmatpush3.bf16.msra.mxu1 %v769_v12 }
  0x27   : > { %740 = vmatpush3.bf16.msra.mxu0 %v775_v18 }
  0x28   : > { %741 = vmatprep.subr.bf16.mxu0 %v786_v1 }
  0x2b   : > { %742 = vmatpush3.bf16.msra.mxu0 %v776_v29 }
  0x2c   : > { %743 = vmatprep.subr.bf16.mxu0 %v786_v1 }
  0x2f   : > { %744 = vmatpush3.bf16.msra.mxu0 %v777_v30 }
  0xe4   : > { %v351_v20 = vpop.f32.mrb[0].mxu0 }
  0xe5   : > { %v352_v21 = vadd.f32 %v655_v19, %v351_v20  ;;  %v707_v22 = vpop.f32.mrb[1].mxu0 }
  0xe6   : > { %v354_v23 = vpop.f32.mrb[2].mxu0 }
  0xe7   : > { %v355_v24 = vadd.f32 %v655_v19, %v354_v23  ;;  %v708_v25 = vpop.f32.mrb[3].mxu0  ;;  %v358_v26 = vmax.f32 %v352_v21, 0.0 }
  0xe9   : > { %v359_v27 = vmax.f32 %v355_v24, 0.0 }
  0xeb   : > { %v360_v28 = vpack.c.bf16 %v359_v27, %v358_v26 }
  0xed   : > { %726 = vmatmul.mubr.bf16.vlgmr.msra.gmra.mrb[0].mxu1 %v360_v28 }
 0x1c0   : > { %v466_v32 = vpop.f32.mrb[0].mxu1 }
 0x1c1   : > { %v467_v33 = vadd.f32 %v660_v31, %v466_v32  ;;  %v727_v34 = vpop.f32.mrb[1].mxu1 }
 0x1c2   : > { %v469_v35 = vpop.f32.mrb[2].mxu1 }
 0x1c3   : > { %v470_v36 = vadd.f32 %v660_v31, %v469_v35  ;;  %v728_v37 = vpop.f32.mrb[3].mxu1  ;;  %v473_v38 = vmax.f32 %v467_v33, 0.0 }
 0x1c5   : > { %v474_v39 = vmax.f32 %v470_v36, 0.0 }
 0x1c7   : > { %v475_v40 = vpack.c.bf16 %v474_v39, %v473_v38 }
 0x1c9   : > { %746 = vmatmul.mubr.bf16.vlgmr.msra.gmra.mrb[4].mxu0 %v475_v40 }
 0x29c   : > { %v581_v42 = vpop.f32.mrb[4].mxu0 }
 0x29d   : > { %v582_v43 = vadd.f32 %v669_v41, %v581_v42  ;;  %v747_v44 = vpop.f32.mrb[5].mxu0 }
 0x29e   : > { %v584_v45 = vpop.f32.mrb[6].mxu0 }
 0x29f   : > { %588 = vst [vmem:[%s280_s11] sm:$0xff] %v582_v43  ;;  %v585_v46 = vadd.f32 %v669_v41, %v584_v45  ;;  %v748_v47 = vpop.f32.mrb[7].mxu0 }
 0x2a1   : > { %589 = vst [vmem:[%s280_s11 + $0x8] sm:$0xff] %v585_v46 }
 0x2a2 PF: > { %s17_s24 = sadd.s32 1, %s784_s24  }
 0x2a3   : > { %p14_p4 = scmp.ge.s32.totalorder %s17_s24, 4  }
 0x2a5   :  { %16 = sbr.rel (!%p14_p4) target bundleno = 1 (0x1), region = 78 }

</bundles_post_ra>
